<compile_context>
chip_gen: v7x
topology: tpu7x:2x2x1
jax: 0.10.0
libtpu: 0.0.40
codegen_flags: <defaults>
</compile_context>

<pallas_src>
import jax
import jax.numpy as jnp
from jax.experimental import pallas as pl
from jax.experimental.pallas import tpu as pltpu

# ---- problem sizes (small, consistent with the module's __init__) ----
B = 2              # number of input expressions (batch)
L = 8              # context expressions per input
BERT_DIM = 128     # stand-in for bert hidden_size (lane-aligned, small)
M = 64             # manifold_dim
E = 16             # emotional_dim
H = 8              # n_heads
DH = M // H        # per-head dim
EMB_PAD = 8        # emb rows padded to one f32 sublane tile
D1 = 2 * M + 2 * E + E          # 176: fused first-layer width [temporal|emotional|uncert]
N_ROWS = EMB_PAD + B * L        # 24 activation rows

# ---- row offsets inside the single packed weight slab (all multiples of 8) ----
R_QKVW = 0      # [64, 192]  (k | q*scale | v), stored [in, out]
R_W1 = 64       # [128, 176] (tw1 | ew1 | uw1)
R_TW2G = 192    # [128, 128] (tw2 | tw2 @ gwa)
R_OWG = 320     # [64, 128]  (ow  | ow  @ gwb)
R_W2EU = 384    # [48, 64]   block-diag: ew2 -> lane 0, uw2 -> lane 1
R_S = 432       # [64, 8]    head selector  S[m,h]  = (m // DH == h)
R_ST = 496      # [8, 64]    head broadcast ST[h,m] = (m // DH == h)
R_QB = 504      # [16, 8]    q broadcast   QB[r,b] = (b == r // L)
R_SEG = 520     # [8, 16]    key reduce    SEG[b,r] = (r // L == b % B)
R_BIAS = 528    # +0 b1(176) +1 qkvb(192) +2 tb2g(128) +3 obg(128) +4 b2eu(64)
W_ROWS = 536
W_LANES = 192

PARAM_ORDER = [
    "tw1", "tb1", "tw2", "tb2",          # temporal_proj
    "ew1", "eb1", "ew2", "eb2",          # emotional_proj
    "uw1", "ub1", "uw2", "ub2",          # uncertainty_proj
    "qw", "qb", "kw", "kb", "vw", "vb",  # MHA in-proj (q/k/v split)
    "ow", "ob",                          # MHA out-proj
    "gwa", "gwb", "gb",                  # context_gate (weight split for the concat)
]


def manifold_kernel(x_ref, w_ref, out_ref):
    f32 = jnp.float32
    x = x_ref[...]                                                     # [24, 128]

    # ---- fused first layer: [temporal(128) | emotional(32) | uncertainty(16)] ----
    w1 = w_ref[R_W1:R_W1 + BERT_DIM, 0:D1]                             # [128, 176]
    b1 = w_ref[R_BIAS + 0:R_BIAS + 1, 0:D1]                            # [1, 176]
    h = jnp.maximum(jnp.dot(x, w1, preferred_element_type=f32) + b1, 0.0)   # [24, 176]

    # ---- temporal second layer fused with the gate's tf-columns (tw2 | tw2@gwa) ----
    tw2g = w_ref[R_TW2G:R_TW2G + 2 * M, 0:2 * M]                       # [128, 128]
    tb2g = w_ref[R_BIAS + 2:R_BIAS + 3, 0:2 * M]                       # [1, 128]
    tf_full = jnp.dot(h[:, 0:2 * M], tw2g, preferred_element_type=f32) + tb2g   # [24, 128]

    # ---- valence / uncertainty heads (block-diag weights -> lanes 0 / 1) ----
    w2eu = w_ref[R_W2EU:R_W2EU + 3 * E, 0:M]                           # [48, 64]
    b2eu = w_ref[R_BIAS + 4:R_BIAS + 5, 0:M]                           # [1, 64]
    vu_pre = jnp.dot(h[0:EMB_PAD, 2 * M:2 * M + 3 * E], w2eu,
                     preferred_element_type=f32) + b2eu                # [8, 64]
    lane = jax.lax.broadcasted_iota(jnp.int32, vu_pre.shape, 1)
    vu = jnp.where(lane == 0, jnp.tanh(vu_pre), jax.nn.sigmoid(vu_pre))  # tanh@0, sigm@1

    # ---- fused K|Q|V projection on all rows (1/sqrt(dh) folded into q columns) ----
    qkvw = w_ref[R_QKVW:R_QKVW + M, 0:3 * M]                           # [64, 192]
    qkvb = w_ref[R_BIAS + 1:R_BIAS + 2, 0:3 * M]                       # [1, 192]
    qkv = jnp.dot(tf_full[:, 0:M], qkvw, preferred_element_type=f32) + qkvb  # [24, 192]
    k = qkv[EMB_PAD:, 0:M]                                             # [16, 64] ctx rows
    q = qkv[0:EMB_PAD, M:2 * M]                                        # [8, 64]  emb rows
    v = qkv[EMB_PAD:, 2 * M:3 * M]                                     # [16, 64] ctx rows

    # ---- batched block-diagonal-selector attention (no per-batch loop) ----
    qb_sel = w_ref[R_QB:R_QB + B * L, 0:EMB_PAD]                       # [16, 8]
    s_sel = w_ref[R_S:R_S + M, 0:H]                                    # [64, 8]
    st_sel = w_ref[R_ST:R_ST + H, 0:M]                                 # [8, 64]
    seg_sel = w_ref[R_SEG:R_SEG + EMB_PAD, 0:B * L]                    # [8, 16]

    q_full = jnp.dot(qb_sel, q, preferred_element_type=f32)            # [16, 64]
    scores = jnp.dot(q_full * k, s_sel, preferred_element_type=f32)    # [16, 8]
    p = jnp.exp(scores - jnp.max(scores, axis=0, keepdims=True))       # stabilized
    p_full = jnp.dot(p, st_sel, preferred_element_type=f32)            # [16, 64]
    attn_un = jnp.dot(seg_sel, p_full * v, preferred_element_type=f32)  # [8, 64]
    denom = jnp.dot(jnp.dot(seg_sel, p, preferred_element_type=f32), st_sel,
                    preferred_element_type=f32)                        # [8, 64]
    attn = attn_un * pl.reciprocal(denom, approx=True)                 # softmax-weighted V

    # ---- out-proj fused with the gate's attended-columns (ow | ow@gwb, bias has gb) ----
    owg = w_ref[R_OWG:R_OWG + M, 0:2 * M]                              # [64, 128]
    obg = w_ref[R_BIAS + 3:R_BIAS + 4, 0:2 * M]                        # [1, 128]
    att_full = jnp.dot(attn, owg, preferred_element_type=f32) + obg    # [8, 128]

    # ---- gate + blend ----
    tf_emb = tf_full[0:EMB_PAD, :]                                     # [8, 128]
    gate = jax.nn.sigmoid(tf_emb[:, M:2 * M] + att_full[:, M:2 * M])   # [8, 64]
    blended = gate * tf_emb[:, 0:M] + (1.0 - gate) * att_full[:, 0:M]  # [8, 64]

    # single lane-dense output: [temporal(0:64) | valence(64) | uncertainty(65) | pad]
    out_ref[...] = jnp.concatenate([blended, vu], axis=1)              # [8, 128]


def prepack_params(p):
    """One-time host-side packing of all parameters into a single [536, 192] slab."""
    f32 = jnp.float32
    scale = 1.0 / (DH ** 0.5)

    def put(slab, r, block):
        rr, cc = block.shape
        return slab.at[r:r + rr, 0:cc].set(block.astype(f32))

    qkvw = jnp.concatenate([p["kw"], p["qw"] * scale, p["vw"]], axis=1)          # [64, 192]
    qkvb = jnp.concatenate([p["kb"], p["qb"] * scale, p["vb"]], axis=1)          # [1, 192]
    w1 = jnp.concatenate([p["tw1"], p["ew1"], p["uw1"]], axis=1)                 # [128, 176]
    b1 = jnp.concatenate([p["tb1"], p["eb1"], p["ub1"]], axis=1)                 # [1, 176]
    tw2g = jnp.concatenate([p["tw2"], p["tw2"] @ p["gwa"]], axis=1)              # [128, 128]
    tb2g = jnp.concatenate([p["tb2"], p["tb2"] @ p["gwa"]], axis=1)              # [1, 128]
    owg = jnp.concatenate([p["ow"], p["ow"] @ p["gwb"]], axis=1)                 # [64, 128]
    obg = jnp.concatenate([p["ob"], p["ob"] @ p["gwb"] + p["gb"]], axis=1)       # [1, 128]
    w2eu = (jnp.zeros((3 * E, M), f32)
            .at[0:2 * E, 0:1].set(p["ew2"])
            .at[2 * E:3 * E, 1:2].set(p["uw2"]))                                 # [48, 64]
    b2eu = (jnp.zeros((1, M), f32)
            .at[0, 0].set(p["eb2"][0, 0])
            .at[0, 1].set(p["ub2"][0, 0]))                                       # [1, 64]

    m_idx = jnp.arange(M)
    h_idx = jnp.arange(H)
    S = (m_idx[:, None] // DH == h_idx[None, :]).astype(f32)                     # [64, 8]
    ST = S.T                                                                     # [8, 64]
    r_idx = jnp.arange(B * L)
    b_idx = jnp.arange(EMB_PAD)
    QB = (b_idx[None, :] == (r_idx[:, None] // L)).astype(f32)                   # [16, 8]
    SEG = ((b_idx[:, None] % B) == (r_idx[None, :] // L)).astype(f32)            # [8, 16]

    slab = jnp.zeros((W_ROWS, W_LANES), f32)
    slab = put(slab, R_QKVW, qkvw)
    slab = put(slab, R_W1, w1)
    slab = put(slab, R_TW2G, tw2g)
    slab = put(slab, R_OWG, owg)
    slab = put(slab, R_W2EU, w2eu)
    slab = put(slab, R_S, S)
    slab = put(slab, R_ST, ST)
    slab = put(slab, R_QB, QB)
    slab = put(slab, R_SEG, SEG)
    slab = put(slab, R_BIAS + 0, b1)
    slab = put(slab, R_BIAS + 1, qkvb)
    slab = put(slab, R_BIAS + 2, tb2g)
    slab = put(slab, R_BIAS + 3, obg)
    slab = put(slab, R_BIAS + 4, b2eu)
    return slab


@jax.jit
def temporal_manifold_forward(emb, ctx_flat, w_slab):
    # Pad emb rows to a full sublane tile so ctx rows start at sublane 8 (aligned slices).
    pad = jnp.zeros((EMB_PAD - B, BERT_DIM), jnp.float32)
    x_all = jnp.concatenate([emb, pad, ctx_flat], axis=0)              # [24, 128]

    out = pl.pallas_call(
        manifold_kernel,
        out_shape=jax.ShapeDtypeStruct((EMB_PAD, 2 * M), jnp.float32),  # [8, 128]
        in_specs=[pl.BlockSpec(memory_space=pltpu.MemorySpace.VMEM)] * 2,
        out_specs=pl.BlockSpec(memory_space=pltpu.MemorySpace.VMEM),
    )(x_all, w_slab)

    temporal = out[:B, 0:M]
    valence = out[:B, M:M + 1]
    uncertainty = out[:B, M + 1:M + 2]
    return temporal, valence, uncertainty


def init_params(key):
    shapes = {
        "tw1": (BERT_DIM, 2 * M), "tb1": (1, 2 * M),
        "tw2": (2 * M, M),        "tb2": (1, M),
        "ew1": (BERT_DIM, 2 * E), "eb1": (1, 2 * E),
        "ew2": (2 * E, 1),        "eb2": (1, 1),
        "uw1": (BERT_DIM, E),     "ub1": (1, E),
        "uw2": (E, 1),            "ub2": (1, 1),
        "qw": (M, M), "qb": (1, M),
        "kw": (M, M), "kb": (1, M),
        "vw": (M, M), "vb": (1, M),
        "ow": (M, M), "ob": (1, M),
        "gwa": (M, M), "gwb": (M, M), "gb": (1, M),
    }
    keys = jax.random.split(key, len(PARAM_ORDER))
    return {n: jax.random.normal(k, shapes[n], jnp.float32) * 0.08
            for n, k in zip(PARAM_ORDER, keys)}


def reference_forward(emb, ctx_flat, p):
    """Pure-JAX reference mirroring the PyTorch forward (with context path)."""
    def mlp(x, w1, b1, w2, b2):
        return jnp.maximum(x @ w1 + b1, 0.0) @ w2 + b2

    tf = mlp(emb, p["tw1"], p["tb1"], p["tw2"], p["tb2"])                  # [B, M]
    cf = mlp(ctx_flat, p["tw1"], p["tb1"], p["tw2"], p["tb2"])             # [B*L, M]

    q = (tf @ p["qw"] + p["qb"]).reshape(B, H, DH) / (DH ** 0.5)
    k = (cf @ p["kw"] + p["kb"]).reshape(B, L, H, DH)
    v = (cf @ p["vw"] + p["vb"]).reshape(B, L, H, DH)
    scores = jnp.einsum("bhd,blhd->bhl", q, k)
    w = jax.nn.softmax(scores, axis=-1)
    attn = jnp.einsum("bhl,blhd->bhd", w, v).reshape(B, M)
    attended = attn @ p["ow"] + p["ob"]

    gate = jax.nn.sigmoid(tf @ p["gwa"] + attended @ p["gwb"] + p["gb"])
    temporal = gate * tf + (1.0 - gate) * attended
    valence = jnp.tanh(jnp.maximum(emb @ p["ew1"] + p["eb1"], 0.0) @ p["ew2"] + p["eb2"])
    unc = jax.nn.sigmoid(jnp.maximum(emb @ p["uw1"] + p["ub1"], 0.0) @ p["uw2"] + p["ub2"])
    return temporal, valence, unc


if __name__ == "__main__":
    key = jax.random.PRNGKey(0)
    k_emb, k_ctx, k_p = jax.random.split(key, 3)

    # synthetic [CLS] embeddings standing in for frozen-BERT output
    emb = jax.random.normal(k_emb, (B, BERT_DIM), jnp.float32)
    ctx_flat = jax.random.normal(k_ctx, (B * L, BERT_DIM), jnp.float32)
    params = init_params(k_p)

    # one-time parameter packing (hoisted out of the per-call hot path)
    w_slab = jax.block_until_ready(prepack_params(params))

    temporal, valence, uncertainty = temporal_manifold_forward(emb, ctx_flat, w_slab)
    jax.block_until_ready((temporal, valence, uncertainty))

    ref_t, ref_v, ref_u = reference_forward(emb, ctx_flat, params)
    # tolerance relaxed slightly for the EUP approximate-reciprocal softmax denominator
    assert jnp.allclose(temporal, ref_t, rtol=2e-3, atol=2e-3)
    assert jnp.allclose(valence, ref_v, rtol=2e-3, atol=2e-3)
    assert jnp.allclose(uncertainty, ref_u, rtol=2e-3, atol=2e-3)

    print("KERNEL_OK")
</pallas_src>

<mosaic_0001>
module attributes {stable_mosaic.version = 11 : i64} {
  func.func @manifold_kernel(%arg0: memref<24x128xf32, #tpu.memory_space<vmem>>, %arg1: memref<536x192xf32, #tpu.memory_space<vmem>>, %arg2: memref<8x128xf32, #tpu.memory_space<vmem>>) attributes {dimension_semantics = [], scalar_prefetch = 0 : i64, scratch_operands = 0 : i64, tpu.core_type = #tpu.core_type<tc>} {
    %c0 = arith.constant 0 : index
    %c0_0 = arith.constant 0 : index
    %0 = vector.load %arg0[%c0, %c0_0] : memref<24x128xf32, #tpu.memory_space<vmem>>, vector<24x128xf32>
    %c64 = arith.constant 64 : index
    %c0_1 = arith.constant 0 : index
    %1 = vector.load %arg1[%c64, %c0_1] : memref<536x192xf32, #tpu.memory_space<vmem>>, vector<128x176xf32>
    %c528 = arith.constant 528 : index
    %c0_2 = arith.constant 0 : index
    %2 = vector.load %arg1[%c528, %c0_2] : memref<536x192xf32, #tpu.memory_space<vmem>>, vector<1x176xf32>
    %cst = arith.constant dense<0.000000e+00> : vector<24x176xf32>
    %3 = tpu.matmul %0, %1, %cst {dimension_numbers = #tpu.dot_dimension_numbers<[1], [0], [0], [1], [0, 0, 1, 1], [], []>} : vector<24x128xf32>, vector<128x176xf32>, vector<24x176xf32> -> vector<24x176xf32>
    %4 = vector.broadcast %2 : vector<1x176xf32> to vector<24x176xf32>
    %5 = arith.addf %3, %4 : vector<24x176xf32>
    %cst_3 = arith.constant 0.000000e+00 : f32
    %6 = vector.broadcast %cst_3 : f32 to vector<24x176xf32>
    %7 = arith.maximumf %5, %6 : vector<24x176xf32>
    %c192 = arith.constant 192 : index
    %c0_4 = arith.constant 0 : index
    %8 = vector.load %arg1[%c192, %c0_4] : memref<536x192xf32, #tpu.memory_space<vmem>>, vector<128x128xf32>
    %c530 = arith.constant 530 : index
    %c0_5 = arith.constant 0 : index
    %9 = vector.load %arg1[%c530, %c0_5] : memref<536x192xf32, #tpu.memory_space<vmem>>, vector<1x128xf32>
    %10 = vector.extract_strided_slice %7 {offsets = [0, 0], sizes = [24, 128], strides = [1, 1]} : vector<24x176xf32> to vector<24x128xf32>
    %cst_6 = arith.constant dense<0.000000e+00> : vector<24x128xf32>
    %11 = tpu.matmul %10, %8, %cst_6 {dimension_numbers = #tpu.dot_dimension_numbers<[1], [0], [0], [1], [0, 0, 1, 1], [], []>} : vector<24x128xf32>, vector<128x128xf32>, vector<24x128xf32> -> vector<24x128xf32>
    %12 = vector.broadcast %9 : vector<1x128xf32> to vector<24x128xf32>
    %13 = arith.addf %11, %12 : vector<24x128xf32>
    %c384 = arith.constant 384 : index
    %c0_7 = arith.constant 0 : index
    %14 = vector.load %arg1[%c384, %c0_7] : memref<536x192xf32, #tpu.memory_space<vmem>>, vector<48x64xf32>
    %c532 = arith.constant 532 : index
    %c0_8 = arith.constant 0 : index
    %15 = vector.load %arg1[%c532, %c0_8] : memref<536x192xf32, #tpu.memory_space<vmem>>, vector<1x64xf32>
    %16 = vector.extract_strided_slice %7 {offsets = [0, 128], sizes = [8, 48], strides = [1, 1]} : vector<24x176xf32> to vector<8x48xf32>
    %cst_9 = arith.constant dense<0.000000e+00> : vector<8x64xf32>
    %17 = tpu.matmul %16, %14, %cst_9 {dimension_numbers = #tpu.dot_dimension_numbers<[1], [0], [0], [1], [0, 0, 1, 1], [], []>} : vector<8x48xf32>, vector<48x64xf32>, vector<8x64xf32> -> vector<8x64xf32>
    %18 = vector.broadcast %15 : vector<1x64xf32> to vector<8x64xf32>
    %19 = arith.addf %17, %18 : vector<8x64xf32>
    %20 = tpu.iota {dimensions = array<i32: 1>} : vector<8x64xi32>
    %c0_i32 = arith.constant 0 : i32
    %21 = vector.broadcast %c0_i32 : i32 to vector<8x64xi32>
    %22 = arith.cmpi eq, %20, %21 : vector<8x64xi32>
    %23 = math.tanh %19 : vector<8x64xf32>
    %24 = arith.negf %19 : vector<8x64xf32>
    %25 = math.exp %24 : vector<8x64xf32>
    %cst_10 = arith.constant 1.000000e+00 : f32
    %26 = vector.broadcast %cst_10 : f32 to vector<8x64xf32>
    %27 = arith.addf %26, %25 : vector<8x64xf32>
    %28 = arith.divf %26, %27 : vector<8x64xf32>
    %29 = arith.select %22, %23, %28 : vector<8x64xi1>, vector<8x64xf32>
    %c0_11 = arith.constant 0 : index
    %c0_12 = arith.constant 0 : index
    %30 = vector.load %arg1[%c0_11, %c0_12] : memref<536x192xf32, #tpu.memory_space<vmem>>, vector<64x192xf32>
    %c529 = arith.constant 529 : index
    %c0_13 = arith.constant 0 : index
    %31 = vector.load %arg1[%c529, %c0_13] : memref<536x192xf32, #tpu.memory_space<vmem>>, vector<1x192xf32>
    %32 = vector.extract_strided_slice %13 {offsets = [0, 0], sizes = [24, 64], strides = [1, 1]} : vector<24x128xf32> to vector<24x64xf32>
    %cst_14 = arith.constant dense<0.000000e+00> : vector<24x192xf32>
    %33 = tpu.matmul %32, %30, %cst_14 {dimension_numbers = #tpu.dot_dimension_numbers<[1], [0], [0], [1], [0, 0, 1, 1], [], []>} : vector<24x64xf32>, vector<64x192xf32>, vector<24x192xf32> -> vector<24x192xf32>
    %34 = vector.broadcast %31 : vector<1x192xf32> to vector<24x192xf32>
    %35 = arith.addf %33, %34 : vector<24x192xf32>
    %36 = vector.extract_strided_slice %35 {offsets = [8, 0], sizes = [16, 64], strides = [1, 1]} : vector<24x192xf32> to vector<16x64xf32>
    %37 = vector.extract_strided_slice %35 {offsets = [0, 64], sizes = [8, 64], strides = [1, 1]} : vector<24x192xf32> to vector<8x64xf32>
    %38 = vector.extract_strided_slice %35 {offsets = [8, 128], sizes = [16, 64], strides = [1, 1]} : vector<24x192xf32> to vector<16x64xf32>
    %c504 = arith.constant 504 : index
    %c0_15 = arith.constant 0 : index
    %39 = vector.load %arg1[%c504, %c0_15] : memref<536x192xf32, #tpu.memory_space<vmem>>, vector<16x8xf32>
    %c432 = arith.constant 432 : index
    %c0_16 = arith.constant 0 : index
    %40 = vector.load %arg1[%c432, %c0_16] : memref<536x192xf32, #tpu.memory_space<vmem>>, vector<64x8xf32>
    %c496 = arith.constant 496 : index
    %c0_17 = arith.constant 0 : index
    %41 = vector.load %arg1[%c496, %c0_17] : memref<536x192xf32, #tpu.memory_space<vmem>>, vector<8x64xf32>
    %c520 = arith.constant 520 : index
    %c0_18 = arith.constant 0 : index
    %42 = vector.load %arg1[%c520, %c0_18] : memref<536x192xf32, #tpu.memory_space<vmem>>, vector<8x16xf32>
    %cst_19 = arith.constant dense<0.000000e+00> : vector<16x64xf32>
    %43 = tpu.matmul %39, %37, %cst_19 {dimension_numbers = #tpu.dot_dimension_numbers<[1], [0], [0], [1], [0, 0, 1, 1], [], []>} : vector<16x8xf32>, vector<8x64xf32>, vector<16x64xf32> -> vector<16x64xf32>
    %44 = arith.mulf %43, %36 : vector<16x64xf32>
    %cst_20 = arith.constant dense<0.000000e+00> : vector<16x8xf32>
    %45 = tpu.matmul %44, %40, %cst_20 {dimension_numbers = #tpu.dot_dimension_numbers<[1], [0], [0], [1], [0, 0, 1, 1], [], []>} : vector<16x64xf32>, vector<64x8xf32>, vector<16x8xf32> -> vector<16x8xf32>
    %cst_21 = arith.constant dense<0xFF800000> : vector<8xf32>
    %46 = vector.multi_reduction <maximumf>, %45, %cst_21 [0] : vector<16x8xf32> to vector<8xf32>
    %47 = vector.shape_cast %46 : vector<8xf32> to vector<1x8xf32>
    %48 = vector.broadcast %47 : vector<1x8xf32> to vector<16x8xf32>
    %49 = arith.subf %45, %48 : vector<16x8xf32>
    %50 = math.exp %49 : vector<16x8xf32>
    %cst_22 = arith.constant dense<0.000000e+00> : vector<16x64xf32>
    %51 = tpu.matmul %50, %41, %cst_22 {dimension_numbers = #tpu.dot_dimension_numbers<[1], [0], [0], [1], [0, 0, 1, 1], [], []>} : vector<16x8xf32>, vector<8x64xf32>, vector<16x64xf32> -> vector<16x64xf32>
    %52 = arith.mulf %51, %38 : vector<16x64xf32>
    %cst_23 = arith.constant dense<0.000000e+00> : vector<8x64xf32>
    %53 = tpu.matmul %42, %52, %cst_23 {dimension_numbers = #tpu.dot_dimension_numbers<[1], [0], [0], [1], [0, 0, 1, 1], [], []>} : vector<8x16xf32>, vector<16x64xf32>, vector<8x64xf32> -> vector<8x64xf32>
    %cst_24 = arith.constant dense<0.000000e+00> : vector<8x8xf32>
    %54 = tpu.matmul %42, %50, %cst_24 {dimension_numbers = #tpu.dot_dimension_numbers<[1], [0], [0], [1], [0, 0, 1, 1], [], []>} : vector<8x16xf32>, vector<16x8xf32>, vector<8x8xf32> -> vector<8x8xf32>
    %cst_25 = arith.constant dense<0.000000e+00> : vector<8x64xf32>
    %55 = tpu.matmul %54, %41, %cst_25 {dimension_numbers = #tpu.dot_dimension_numbers<[1], [0], [0], [1], [0, 0, 1, 1], [], []>} : vector<8x8xf32>, vector<8x64xf32>, vector<8x64xf32> -> vector<8x64xf32>
    %56 = tpu.reciprocal %55 {approx = true} : vector<8x64xf32> -> vector<8x64xf32>
    %57 = arith.mulf %53, %56 : vector<8x64xf32>
    %c320 = arith.constant 320 : index
    %c0_26 = arith.constant 0 : index
    %58 = vector.load %arg1[%c320, %c0_26] : memref<536x192xf32, #tpu.memory_space<vmem>>, vector<64x128xf32>
    %c531 = arith.constant 531 : index
    %c0_27 = arith.constant 0 : index
    %59 = vector.load %arg1[%c531, %c0_27] : memref<536x192xf32, #tpu.memory_space<vmem>>, vector<1x128xf32>
    %cst_28 = arith.constant dense<0.000000e+00> : vector<8x128xf32>
    %60 = tpu.matmul %57, %58, %cst_28 {dimension_numbers = #tpu.dot_dimension_numbers<[1], [0], [0], [1], [0, 0, 1, 1], [], []>} : vector<8x64xf32>, vector<64x128xf32>, vector<8x128xf32> -> vector<8x128xf32>
    %61 = vector.broadcast %59 : vector<1x128xf32> to vector<8x128xf32>
    %62 = arith.addf %60, %61 : vector<8x128xf32>
    %63 = vector.extract_strided_slice %13 {offsets = [0, 0], sizes = [8, 128], strides = [1, 1]} : vector<24x128xf32> to vector<8x128xf32>
    %64 = vector.extract_strided_slice %63 {offsets = [0, 64], sizes = [8, 64], strides = [1, 1]} : vector<8x128xf32> to vector<8x64xf32>
    %65 = vector.extract_strided_slice %62 {offsets = [0, 64], sizes = [8, 64], strides = [1, 1]} : vector<8x128xf32> to vector<8x64xf32>
    %66 = arith.addf %64, %65 : vector<8x64xf32>
    %67 = arith.negf %66 : vector<8x64xf32>
    %68 = math.exp %67 : vector<8x64xf32>
    %cst_29 = arith.constant 1.000000e+00 : f32
    %69 = vector.broadcast %cst_29 : f32 to vector<8x64xf32>
    %70 = arith.addf %69, %68 : vector<8x64xf32>
    %71 = arith.divf %69, %70 : vector<8x64xf32>
    %72 = vector.extract_strided_slice %63 {offsets = [0, 0], sizes = [8, 64], strides = [1, 1]} : vector<8x128xf32> to vector<8x64xf32>
    %73 = arith.mulf %71, %72 : vector<8x64xf32>
    %cst_30 = arith.constant 1.000000e+00 : f32
    %74 = vector.broadcast %cst_30 : f32 to vector<8x64xf32>
    %75 = arith.subf %74, %71 : vector<8x64xf32>
    %76 = vector.extract_strided_slice %62 {offsets = [0, 0], sizes = [8, 64], strides = [1, 1]} : vector<8x128xf32> to vector<8x64xf32>
    %77 = arith.mulf %75, %76 : vector<8x64xf32>
    %78 = arith.addf %73, %77 : vector<8x64xf32>
    %79 = tpu.concatenate %78, %29 in 1 : vector<8x64xf32>, vector<8x64xf32> -> vector<8x128xf32>
    %c0_31 = arith.constant 0 : index
    %c0_32 = arith.constant 0 : index
    %80 = vector.load %arg2[%c0_31, %c0_32] : memref<8x128xf32, #tpu.memory_space<vmem>>, vector<8x128xf32>
    tpu.vector_store %arg2[%c0_31, %c0_32], %79 {strides = array<i32>} : memref<8x128xf32, #tpu.memory_space<vmem>>, vector<8x128xf32>,
    return
  }
}

</mosaic_0001>

<bundles_post_ra>
// kernel: temporal_manifold_forward.1
= control target key start
LH: loop header
LB: loop body
LE: loop exit
PB: predicated region body
PF: predicated region fallthrough
CT: control target
= control target key end

     0   :  { %v1401_v3 = vmov 0.0   ;;  %v1402_v4 = vmov 0.0|0.0   ;;  %vm1403_vm0 = vmmov 0   ;;  %vm248_vm1 = vcmask 392192   ;;  %s1404_s7 = smov 64   ;;  %s1804_s1 = inlined_call_operand.vmem [shape: f32[536,192], index: 1, kind: input, shape index: {}]   ;;  %s1805_s0 = inlined_call_operand.vmem [shape: f32[24,128], index: 0, kind: input, shape index: {}]   ;;  %s1806_s2 = inlined_call_operand.vmem [shape: f32[8,128], index: 2, kind: output, shape index: {}]  }
   0x1   :  { %v15_v0 = vld [vmem:[%s1804_s1 + $0x88] sm:$0xff]  ;;  %v17_v1 = vld [vmem:[%s1804_s1 + $0x98] sm:$0xff]  ;;  %v14_v2 = vld [vmem:[%s1804_s1 + $0x80] sm:$0xff]  ;;  %123 = vmatprep.mubr.f32.mxu0 %v1401_v3  ;;  %1298 = vmatprep.subr.bf16.mxu1 %v1402_v4  ;;  %vm362_vm2 = vcmask 523264   ;;  %vm470_vm3 = vcmask 64512   ;;  %vm733_vm5 = vcmask 130048  }
   0x2   :  { %v1266_v5 = vpack.c.bf16 %v17_v1, %v15_v0  ;;  %v16_v6 = vld [vmem:[%s1804_s1 + $0x90] sm:$0xff]  ;;  %v19_v7 = vld [vmem:[%s1804_s1 + $0xa8] sm:$0xff]  ;;  %v21_v8 = vld [vmem:[%s1804_s1 + $0xb8] sm:$0xff]  ;;  %1175 = vmatprep.mubr.msk.f32.mxu1 %vm1403_vm0, %v1401_v3 }
   0x3   :  { %v1268_v9 = vpack.c.bf16 %v16_v6, %v14_v2  ;;  %v1270_v10 = vpack.c.bf16 %v21_v8, %v19_v7  ;;  %v18_v11 = vld [vmem:[%s1804_s1 + $0xa0] sm:$0xff]  ;;  %v20_v12 = vld [vmem:[%s1804_s1 + $0xb0] sm:$0xff]  ;;  %v23_v13 = vld [vmem:[%s1804_s1 + $0xc8] sm:$0xff] }
   0x4   :  { %1267 = vmatprep.subr.bf16.mxu0 %v1266_v5  ;;  %v25_v14 = vld [vmem:[%s1804_s1 + $0xd8] sm:$0xff]  ;;  %v1272_v15 = vpack.c.bf16 %v20_v12, %v18_v11  ;;  %v22_v17 = vld [vmem:[%s1804_s1 + $0xc0] sm:$0xff]  ;;  %v24_v18 = vld [vmem:[%s1804_s1 + $0xd0] sm:$0xff] }
   0x5   :  { %1269 = vmatpush1.bf16.msra.mxu0 %v1268_v9  ;;  %v1274_v16 = vpack.c.bf16 %v25_v14, %v23_v13  ;;  %v27_v19 = vld [vmem:[%s1804_s1 + $0xe8] sm:$0xff]  ;;  %v29_v20 = vld [vmem:[%s1804_s1 + $0xf8] sm:$0xff]  ;;  %v1276_v21 = vpack.c.bf16 %v24_v18, %v22_v17  ;;  %v26_v23 = vld [vmem:[%s1804_s1 + $0xe0] sm:$0xff] }
   0x6   :  { %1271 = vmatprep.subr.bf16.mxu0 %v1270_v10  ;;  %v1278_v22 = vpack.c.bf16 %v29_v20, %v27_v19  ;;  %v28_v24 = vld [vmem:[%s1804_s1 + $0xf0] sm:$0xff]  ;;  %v31_v25 = vld [vmem:[%s1804_s1 + $0x108] sm:$0xff]  ;;  %v33_v26 = vld [vmem:[%s1804_s1 + $0x118] sm:$0xff] }
   0x7   :  { %v144_v27 = vld [vmem:[%s1804_s1 + $0x180] sm:$0xff]  ;;  %v145_v28 = vld [vmem:[%s1804_s1 + $0x190] sm:$0xff]  ;;  %v1280_v30 = vpack.c.bf16 %v28_v24, %v26_v23  ;;  %v1282_v33 = vpack.c.bf16 %v33_v26, %v31_v25  ;;  %v35_v36 = vld [vmem:[%s1804_s1 + $0x128] sm:$0xff] }
   0x8   :  { %v146_v29 = vld [vmem:[%s1804_s1 + $0x1a0] sm:$0xff]  ;;  %v1299_v31 = vpack.c.bf16 %v145_v28, %v144_v27  ;;  %v147_v32 = vld [vmem:[%s1804_s1 + $0x1b0] sm:$0xff]  ;;  %v37_v37 = vld [vmem:[%s1804_s1 + $0x138] sm:$0xff]  ;;  %v49_v27 = vlaneseq }
   0x9   :  { %1273 = vmatpush1.bf16.msra.mxu0 %v1272_v15  ;;  %v30_v34 = vld [vmem:[%s1804_s1 + $0x100] sm:$0xff]  ;;  %v32_v35 = vld [vmem:[%s1804_s1 + $0x110] sm:$0xff]  ;;  %v1302_v38 = vpack.c.bf16 %v147_v32, %v146_v29  ;;  %v1286_v42 = vpack.c.bf16 %v37_v37, %v35_v36  ;;  %v39_v45 = vld [vmem:[%s1804_s1 + $0x148] sm:$0xff] }
   0xa   :  { %1275 = vmatprep.subr.bf16.mxu0 %v1274_v16  ;;  %1300 = vmatpush3.bf16.msra.mxu1 %v1299_v31  ;;  %v148_v39 = vld [vmem:[%s1804_s1 + $0x1c0] sm:$0xff]  ;;  %v149_v40 = vld [vmem:[%s1804_s1 + $0x1d0] sm:$0xff]  ;;  %v1284_v41 = vpack.c.bf16 %v32_v35, %v30_v34  ;;  %v41_v46 = vld [vmem:[%s1804_s1 + $0x158] sm:$0xff]  ;;  %v1616_v28 = vshrl.u32 %v49_v27, 7 }
   0xb   :  { %1301 = vmatprep.subr.bf16.mxu1 %v1402_v4  ;;  %v34_v43 = vld [vmem:[%s1804_s1 + $0x120] sm:$0xff]  ;;  %v36_v44 = vld [vmem:[%s1804_s1 + $0x130] sm:$0xff]  ;;  %v1305_v47 = vpack.c.bf16 %v149_v40, %v148_v39  ;;  %v1290_v51 = vpack.c.bf16 %v41_v46, %v39_v45  ;;  %v43_v54 = vld [vmem:[%s1804_s1 + $0x168] sm:$0xff] }
   0xc   :  { %v150_v48 = vld [vmem:[%s1804_s1 + $0x1e0] sm:$0xff]  ;;  %v151_v49 = vld [vmem:[%s1804_s1 + $0x1f0] sm:$0xff]  ;;  %v1288_v50 = vpack.c.bf16 %v36_v44, %v34_v43  ;;  %v45_v55 = vld [vmem:[%s1804_s1 + $0x178] sm:$0xff]  ;;  %v51_v29 = vsub.s32 0, %v1616_v28  ;;  %v55_v31 = vsub.s32 1, %v1616_v28 }
   0xd   :  { %1277 = vmatpush1.bf16.msra.mxu0 %v1276_v21  ;;  %v38_v52 = vld [vmem:[%s1804_s1 + $0x140] sm:$0xff]  ;;  %v40_v53 = vld [vmem:[%s1804_s1 + $0x150] sm:$0xff]  ;;  %v1308_v56 = vpack.c.bf16 %v151_v49, %v150_v48  ;;  %v1294_v60 = vpack.c.bf16 %v45_v55, %v43_v54  ;;  %v12_v15 = vld [vmem:[%s1805_s0 + $0x8] sm:$0xff] }
   0xe   :  { %1279 = vmatprep.subr.bf16.mxu0 %v1278_v22  ;;  %1303 = vmatpush3.bf16.msra.mxu1 %v1302_v38  ;;  %v152_v57 = vld [vmem:[%s1804_s1 + $0x200] sm:$0xff]  ;;  %v153_v58 = vld [vmem:[%s1804_s1 + $0x210] sm:$0xff]  ;;  %v1292_v59 = vpack.c.bf16 %v40_v53, %v38_v52  ;;  %v334_v24 = vld [vmem:[%s1804_s1 + $0x8] sm:$0xff] }
   0xf   :  { %1304 = vmatprep.subr.bf16.mxu1 %v1402_v4  ;;  %v42_v61 = vld [vmem:[%s1804_s1 + $0x160] sm:$0xff]  ;;  %v44_v62 = vld [vmem:[%s1804_s1 + $0x170] sm:$0xff]  ;;  %v1311_v63 = vpack.c.bf16 %v153_v58, %v152_v57  ;;  %v336_v25 = vld [vmem:[%s1804_s1 + $0x18] sm:$0xff] }
  0x10   :  { %v154_v0 = vld [vmem:[%s1804_s1 + $0x220] sm:$0xff]  ;;  %v155_v1 = vld [vmem:[%s1804_s1 + $0x230] sm:$0xff]  ;;  %v1296_v2 = vpack.c.bf16 %v44_v62, %v42_v61  ;;  %v1331_v26 = vpack.c.bf16 %v336_v25, %v334_v24  ;;  %v338_v37 = vld [vmem:[%s1804_s1 + $0x28] sm:$0xff] }
  0x11   :  { %1281 = vmatpush1.bf16.msra.mxu0 %v1280_v30  ;;  %v241_v5 = vld [vmem:[%s1804_s1 + $0x300] sm:$0xff]  ;;  %v242_v6 = vld [vmem:[%s1804_s1 + $0x310] sm:$0xff]  ;;  %v1314_v7 = vpack.c.bf16 %v155_v1, %v154_v0  ;;  %v340_v38 = vld [vmem:[%s1804_s1 + $0x38] sm:$0xff] }
  0x12   :  { %1283 = vmatprep.subr.bf16.mxu0 %v1282_v33  ;;  %1306 = vmatpush3.bf16.msra.mxu1 %v1305_v47  ;;  %v156_v8 = vld [vmem:[%s1804_s1 + $0x240] sm:$0xff]  ;;  %v157_v9 = vld [vmem:[%s1804_s1 + $0x250] sm:$0xff]  ;;  %v1323_v11 = vpack.c.bf16 %v242_v6, %v241_v5  ;;  %v1335_v44 = vpack.c.bf16 %v340_v38, %v338_v37  ;;  %v342_v49 = vld [vmem:[%s1804_s1 + $0x48] sm:$0xff] }
  0x13   :  { %1307 = vmatprep.subr.bf16.mxu1 %v1402_v4  ;;  %v11_v10 = vld [vmem:[%s1805_s0] sm:$0xff]  ;;  %v244_v13 = vld [vmem:[%s1804_s1 + $0x330] sm:$0xff]  ;;  %v1317_v14 = vpack.c.bf16 %v157_v9, %v156_v8 }
  0x14   :  { %v243_v12 = vld [vmem:[%s1804_s1 + $0x320] sm:$0xff]  ;;  %v13_v17 = vld [vmem:[%s1805_s0 + $0x10] sm:$0xff] }
  0x15   :  { %1285 = vmatpush1.bf16.msra.mxu0 %v1284_v41  ;;  %v1326_v16 = vpack.c.bf16 %v244_v13, %v243_v12  ;;  %v158_v18 = vld [vmem:[%s1804_s1 + $0x260] sm:$0xff]  ;;  %v159_v19 = vld [vmem:[%s1804_s1 + $0x270] sm:$0xff] }
  0x16   :  { %1287 = vmatprep.subr.bf16.mxu0 %v1286_v42  ;;  %1309 = vmatpush3.bf16.msra.mxu1 %v1308_v56  ;;  %v1320_v20 = vpack.c.bf16 %v159_v19, %v158_v18  ;;  %v245_v21 = vld [vmem:[%s1804_s1 + $0x340] sm:$0xff]  ;;  %v246_v22 = vld [vmem:[%s1804_s1 + $0x350] sm:$0xff] }
  0x17   :  { %1310 = vmatprep.subr.bf16.mxu1 %v1402_v4  ;;  %v1329_v23 = vpack.c.bf16 %v246_v22, %v245_v21  ;;  %v1066_v30 = vld [vmem:[%s1804_s1 + $0x420] ss:$8 sm:$0x3]  ;;  %v335_v35 = vld [vmem:[%s1804_s1 + $0x10] sm:$0xff]  ;;  %v247_v19 = vld [vmem:[%s1804_s1 + $0x424] ss:$0 sm:$0xff] }
  0x18   :  { %v52_v32 = vrot.slane %v1066_v30, %v51_v29  ;;  %v56_v33 = vrot.slane %v1066_v30, %v55_v31  ;;  %v333_v34 = vld [vmem:[%s1804_s1] sm:$0xff]  ;;  %v339_v46 = vld [vmem:[%s1804_s1 + $0x30] sm:$0xff] }
  0x19   :  { %1289 = vmatpush1.bf16.msra.mxu0 %v1288_v50  ;;  %v1333_v42 = vpack.c.bf16 %v335_v35, %v333_v34  ;;  %v337_v45 = vld [vmem:[%s1804_s1 + $0x20] sm:$0xff]  ;;  %v344_v50 = vld [vmem:[%s1804_s1 + $0x58] sm:$0xff]  ;;  %v343_v57 = vld [vmem:[%s1804_s1 + $0x50] sm:$0xff] }
  0x1a   :  { %1291 = vmatprep.subr.bf16.mxu0 %v1290_v51  ;;  %1312 = vmatpush3.bf16.msra.mxu1 %v1311_v63  ;;  %v1337_v53 = vpack.c.bf16 %v339_v46, %v337_v45  ;;  %v1339_v55 = vpack.c.bf16 %v344_v50, %v342_v49  ;;  %v341_v56 = vld [vmem:[%s1804_s1 + $0x40] sm:$0xff]  ;;  %v347_v5 = vld [vmem:[%s1804_s1 + $0x70] sm:$0xff] }
  0x1b   :  { %1313 = vmatprep.subr.bf16.mxu1 %v1402_v4  ;;  %v1341_v63 = vpack.c.bf16 %v343_v57, %v341_v56  ;;  %v1695_v25 = vld [vmem:[%s1804_s1 + $0x421] ss:$8 sm:$0x3]  ;;  %v459_v35 = vld [vmem:[%s1804_s1 + $0x390] sm:$0xff] }
  0x1c   :  { %v456_v30 = vld [vmem:[%s1804_s1 + $0x360] sm:$0xff]  ;;  %v461_v37 = vld [vmem:[%s1804_s1 + $0x3b0] sm:$0xff] }
  0x1d   :  { %1293 = vmatpush1.bf16.msra.mxu0 %v1292_v59  ;;  %v346_v59 = vld [vmem:[%s1804_s1 + $0x68] sm:$0xff]  ;;  %v952_v28 = vld [vmem:[%s1804_s1 + $0x280] sm:$0xff] }
  0x1e   :  { %1295 = vmatprep.subr.bf16.mxu0 %v1294_v60  ;;  %1315 = vmatpush3.bf16.msra.mxu1 %v1314_v7  ;;  %v348_v60 = vld [vmem:[%s1804_s1 + $0x78] sm:$0xff]  ;;  %v160_v7 = vld [vmem:[%s1804_s1 + $0x422] ss:$0 sm:$0xff] }
  0x1f   :  { %1316 = vmatprep.subr.bf16.mxu1 %v1402_v4  ;;  %v1343_v1 = vpack.c.bf16 %v348_v60, %v346_v59  ;;  %v464_v60 = vld [vmem:[%s1804_s1 + $0x3e0] sm:$0xff] }
  0x21   :  { %1297 = vmatpush1.bf16.msra.mxu0 %v1296_v2  ;;  %v345_v2 = vld [vmem:[%s1804_s1 + $0x60] sm:$0xff] }
  0x22   :  { %1322 = vmatprep.subr.bf16.mxu0 %v1402_v4  ;;  %1318 = vmatpush3.bf16.msra.mxu1 %v1317_v14  ;;  %v1345_v6 = vpack.c.bf16 %v347_v5, %v345_v2 }
  0x23   :  { %1319 = vmatprep.subr.bf16.mxu1 %v1402_v4 }
  0x24   :  { %124 = vmatmul.mubr.f32.vlgmr.msra.gmra.mrb[0].mxu0 %v11_v10 }
  0x25   :  { %129 = vmatprep.mubr.f32.mxu0 %v1401_v3  ;;  %1324 = vmatpush3.bf16.msra.mxu0 %v1323_v11 }
  0x26   :  { %1325 = vmatprep.subr.bf16.mxu0 %v1402_v4  ;;  %1321 = vmatpush3.bf16.msra.mxu1 %v1320_v20 }
  0x27   :  { %1332 = vmatprep.subr.bf16.mxu1 %v1331_v26  ;;  %v355_v26 = vrot.slane %v1695_v25, %v51_v29  ;;  %v460_v29 = vld [vmem:[%s1804_s1 + $0x3a0] sm:$0xff] }
  0x28   :  { %130 = vmatmul.mubr.f32.gmra.mrb[2].mxu0 %v12_v15 }
  0x29   :  { %134 = vmatprep.mubr.f32.mxu0 %v1401_v3  ;;  %1327 = vmatpush3.bf16.msra.mxu0 %v1326_v16 }
  0x2a   :  { %1328 = vmatprep.subr.bf16.mxu0 %v1402_v4 }
  0x2c   :  { %135 = vmatmul.mubr.f32.gmra.mrb[4].mxu0 %v13_v17 }
  0x2d   :  { %1330 = vmatpush3.bf16.msra.mxu0 %v1329_v23  ;;  %1196 = vmatprep.mubr.msk.f32.mxu0 %vm1403_vm0, %v1401_v3  ;;  %v454_v23 = vld [vmem:[%s1804_s1 + $0x3f0] sm:$0xff] }
  0xf7   :  { %v125_v36 = vpop.f32.mrb[0].mxu0 }
  0xf8   :  { %v126_v39 = vadd.f32 %v125_v36, %v52_v32  ;;  %v127_v40 = vpop.f32.mrb[1].mxu0 }
  0xf9   :  { %v128_v41 = vadd.f32 %v127_v40, %v56_v33  ;;  %v458_v33 = vld [vmem:[%s1804_s1 + $0x380] sm:$0xff] }
  0xfa   :  { %v140_v43 = vmax.f32 %v126_v39, 0.0  ;;  %v1351_v36 = vpack.c.bf16 %v459_v35, %v458_v33 }
  0xfb   :  { %v141_v47 = vmax.f32 %v128_v41, 0.0  ;;  %v131_v48 = vpop.f32.mrb[2].mxu0  ;;  %v1355_v41 = vpack.c.bf16 %v461_v37, %v460_v29  ;;  %v957_v29 = vld [vmem:[%s1804_s1 + $0x2d0] sm:$0xff] }
  0xfc   :  { %1176 = vmatmul.mubr.f32.vlgmr.msra.gmra.mrb[0].mxu1 %v140_v43  ;;  %v132_v51 = vadd.f32 %v131_v48, %v52_v32  ;;  %v133_v52 = vpop.f32.mrb[3].mxu0 }
  0xfd   :  { %1197 = vmatmul.mubr.msk.f32.vlgmr.msra.gmra.mrb[6].mxu0 %vm248_vm1, %v141_v47  ;;  %1334 = vmatpush1.bf16.msra.mxu1 %v1333_v42  ;;  %v323_v42 = vand.u32 127, %v49_v27  ;;  %v455_v52 = vld [vmem:[%s1804_s1 + $0x400] sm:$0xff] }
  0xfe   :  { %v142_v54 = vmax.f32 %v132_v51, 0.0  ;;  %1336 = vmatprep.subr.bf16.mxu1 %v1335_v44  ;;  %1178 = vmatprep.mubr.msk.f32.mxu1 %vm1403_vm0, %v1401_v3 }
  0xff   :  { %v136_v58 = vpop.f32.mrb[4].mxu0  ;;  %1201 = vmatprep.mubr.msk.f32.mxu0 %vm470_vm3, %v454_v23  ;;  %vm324_vm4 = vcmp.eq.s32.totalorder %v323_v42, 0 }
 0x100   :  { %v137_v61 = vadd.f32 %v136_v58, %v52_v32  ;;  %v138_v62 = vpop.f32.mrb[5].mxu0  ;;  %1179 = vmatmul.mubr.f32.gmra.mrb[2].mxu1 %v142_v54  ;;  %v457_v32 = vld [vmem:[%s1804_s1 + $0x370] sm:$0xff] }
 0x101   :  { %1338 = vmatpush1.bf16.msra.mxu1 %v1337_v53  ;;  %1181 = vmatprep.mubr.msk.f32.mxu1 %vm1403_vm0, %v1401_v3  ;;  %v1347_v34 = vpack.c.bf16 %v457_v32, %v456_v30  ;;  %v462_v53 = vld [vmem:[%s1804_s1 + $0x3c0] sm:$0xff]  ;;  %v463_v54 = vld [vmem:[%s1804_s1 + $0x3d0] sm:$0xff] }
 0x102   :  { %v143_v0 = vmax.f32 %v137_v61, 0.0  ;;  %1340 = vmatprep.subr.bf16.mxu1 %v1339_v55  ;;  %v1359_v55 = vpack.c.bf16 %v463_v54, %v462_v53 }
 0x104   :  { %1182 = vmatmul.mubr.f32.gmra.mrb[4].mxu1 %v143_v0 }
 0x105   :  { %1342 = vmatpush1.bf16.msra.mxu1 %v1341_v63  ;;  %436 = vmatprep.mubr.f32.mxu1 %v1401_v3 }
 0x106   :  { %1344 = vmatprep.subr.bf16.mxu1 %v1343_v1 }
 0x109   :  { %1346 = vmatpush1.bf16.msra.mxu1 %v1345_v6 }
 0x10a   :  { %1348 = vmatprep.subr.bf16.mxu1 %v1347_v34 }
 0x1cf   :  { %v227_v8 = vpop.f32.mrb[0].mxu1 }
 0x1d0   :  { %v1677_v9 = vadd.f32 %v227_v8, %v160_v7  ;;  %v1177_v10 = vpop.f32.mrb[1].mxu1  ;;  %v318_v11 = vpop.f32.mrb[6].mxu0 }
 0x1d1   :  { %v1198_v12 = vpop.f32.mrb[7].mxu0  ;;  %v319_v20 = vadd.f32 %v318_v11, %v247_v19  ;;  %v359_v19 = vrot.slane %v1695_v25, %v55_v31  ;;  %v953_v31 = vld [vmem:[%s1804_s1 + $0x290] sm:$0xff] }
 0x1d2   :  { %1070 = vmatmul.mubr.msk.f32.vlgmr.msra.gmra.mrb[6].mxu1 %vm362_vm2, %v1677_v9  ;;  %v1370_v25 = vpack.c.bf16 %v953_v31, %v952_v28 }
 0x1d3   :  { %v232_v13 = vpop.f32.mrb[2].mxu1  ;;  %441 = vmatprep.mubr.f32.mxu1 %v1401_v3  ;;  %v1068_v21 = vmul.f32 -1.442695, %v319_v20  ;;  %1350 = vmatpush3.bf16.msra.mxu1 %v1347_v34  ;;  %v954_v34 = vld [vmem:[%s1804_s1 + $0x2a0] sm:$0xff] }
 0x1d4   :  { %v233_v14 = vadd.f32 %v232_v13, %v160_v7  ;;  %v1180_v15 = vpop.f32.mrb[3].mxu1  ;;  %1352 = vmatprep.subr.bf16.mxu1 %v1351_v36 }
 0x1d5   :  { %1385 = vpow2.f32 %v1068_v21 }
 0x1d6   :  { %1071 = vmatmul.mubr.msk.f32.gmra.mrb[8].mxu1 %vm362_vm2, %v233_v14 }
 0x1d7   :  { %v237_v16 = vpop.f32.mrb[4].mxu1  ;;  %447 = vmatprep.mubr.f32.mxu1 %v1401_v3  ;;  %1354 = vmatpush3.bf16.msra.mxu1 %v1351_v36  ;;  %v956_v36 = vld [vmem:[%s1804_s1 + $0x2c0] sm:$0xff] }
 0x1d8   :  { %v238_v17 = vadd.f32 %v237_v16, %v160_v7  ;;  %v1183_v18 = vpop.f32.mrb[5].mxu1  ;;  %1356 = vmatprep.subr.bf16.mxu1 %v1355_v41  ;;  %v1376_v37 = vpack.c.bf16 %v957_v29, %v956_v36 }
 0x1d9   :  { %v465_v18 = vld [vmem:[%s1804_s1 + $0x410] sm:$0xff] }
 0x1da   :  { %1072 = vmatmul.mubr.msk.f32.gmra.mrb[10].mxu1 %vm362_vm2, %v238_v17 }
 0x1db   :  { %1358 = vmatpush3.bf16.msra.mxu1 %v1355_v41 }
 0x1dc   :  { %1360 = vmatprep.subr.bf16.mxu1 %v1359_v55 }
 0x1df   :  { %v1386_v22 = vpop.eup %1385  ;;  %1362 = vmatpush3.bf16.msra.mxu1 %v1359_v55 }
 0x1e0   :  { %v329_v24 = vadd.f32 1.0, %v1386_v22  ;;  %1363 = vmatprep.subr.bf16.mxu1 %v1402_v4 }
 0x1e2   :  { %1387 = vrcp.f32 %v329_v24 }
 0x1e3   :  { %1389 = vtanh.f32 %v319_v20 }
 0x1ec   :  { %v1388_v46 = vpop.eup %1387 }
 0x1ed   :  { %v1390_v48 = vpop.eup %1389 }
 0x1ee   :  { %v332_v51 = vsel %vm324_vm4, %v1390_v48, %v1388_v46 }
 0x2a5   :  { %v438_v38 = vpop.f32.mrb[6].mxu1 }
 0x2a6   :  { %v439_v39 = vadd.f32 %v438_v38, %v355_v26  ;;  %v440_v40 = vpop.f32.mrb[7].mxu1  ;;  %v958_v38 = vld [vmem:[%s1804_s1 + $0x2e0] sm:$0xff] }
 0x2a8   :  { %467 = vrot.lane.b32.xlu0 %v439_v39, %s1404_s7  ;;  %v959_v39 = vld [vmem:[%s1804_s1 + $0x2f0] sm:$0xff] }
 0x2a9   :  { %v443_v43 = vpop.f32.mrb[8].mxu1  ;;  %v1379_v40 = vpack.c.bf16 %v959_v39, %v958_v38 }
 0x2aa   :  { %v444_v44 = vadd.f32 %v443_v43, %v355_v26  ;;  %v1720_v45 = vpop.f32.mrb[9].mxu1 }
 0x2ab   :  { %v446_v21 = vadd.f32 %v1720_v45, %v359_v19 }
 0x2ac   :  { %1041 = vrot.lane.b32.xlu0 %v1677_v9, %s1404_s7 }
 0x2ad   :  { %v449_v47 = vpop.f32.mrb[10].mxu1 }
 0x2ae   :  { %v450_v49 = vadd.f32 %v449_v47, %v355_v26  ;;  %v451_v50 = vpop.f32.mrb[11].mxu1 }
 0x2af   :  { %v452_v20 = vadd.f32 %v451_v50, %v359_v19 }
 0x2b0   :  { %1057 = vrot.lane.b32.xlu0 %v332_v51, %s1404_s7 }
 0x31a   :  { %v468_v27 = vpop.permute.xlu0 %467 }
 0x31b   :  { %1199 = vmatprep.subr.mxu0 %v468_v27 }
 0x31c   :  { %1200 = vmatpush3.msra.mxu0 %v468_v27 }
 0x31d   :  { %1202 = vmatmul.mubr.msk.f32.vlgmr.msra.gmra.mrb[8].mxu0 %vm470_vm3, %v455_v52  ;;  %1223 = vmatprep.subr.mxu0 %v464_v60 }
 0x31e   :  { %1224 = vmatpush3.msra.mxu0 %v464_v60  ;;  %v1042_v55 = vpop.permute.xlu0 %1041 }
 0x31f   :  { %1366 = vmatprep.subr.bf16.mxu0 %v1402_v4 }
 0x3f0   :  { %v1203_v56 = vpop.f32.mrb[8].mxu0 }
 0x3f1   :  { %v553_v57 = vmul.f32 %v1203_v56, %v450_v49  ;;  %v543_v58 = vpop.f32.mrb[9].mxu0 }
 0x3f2   :  { %v552_v59 = vmul.f32 %v543_v58, %v444_v44 }
 0x3f4   :  { %1220 = vmatprep.mubr.msk.f32.mxu1 %vm362_vm2, %v552_v59 }
 0x3f5   :  { %1221 = vmatmul.mubr.msk.f32.vlgmr.msra.gmra.mrb[12].mxu1 %vm362_vm2, %v553_v57 }
 0x3f6   :  { %1232 = vmatprep.mubr.msk.f32.mxu1 %vm1403_vm0, %v1401_v3 }
 0x4c8   :  { %v1222_v61 = vpop.f32.mrb[12].mxu1 }
 0x4c9   :  { %v636_v62 = vsel %vm470_vm3, %v1222_v61, -inf  ;;  %v626_v63 = vpop.f32.mrb[13].mxu1 }
 0x4ca   :  { %v635_v0 = vsel %vm470_vm3, %v626_v63, -inf }
 0x4cb   :  { %v637_v1 = vmax.f32 %v635_v0, %v636_v62 }
 0x4cd   :  { %v638_v2 = vrot.slane %v637_v1, 4 }
 0x4cf   :  { %v639_v5 = vmax.f32 %v637_v1, %v638_v2 }
 0x4d1   :  { %v640_v6 = vrot.slane %v639_v5, 2 }
 0x4d3   :  { %v641_v7 = vmax.f32 %v639_v5, %v640_v6 }
 0x4d5   :  { %v642_v8 = vrot.slane %v641_v7, 1 }
 0x4d7   :  { %v643_v10 = vmax.f32 %v641_v7, %v642_v8 }
 0x4d9   :  { %v644_v11 = vsub.f32 %v626_v63, %v643_v10  ;;  %v645_v12 = vsub.f32 %v1222_v61, %v643_v10 }
 0x4db   :  { %v646_v13 = vmul.f32 1.442695, %v644_v11  ;;  %v648_v14 = vmul.f32 1.442695, %v645_v12 }
 0x4dd   :  { %1391 = vpow2.f32 %v646_v13 }
 0x4de   :  { %1393 = vpow2.f32 %v648_v14 }
 0x4e7   :  { %v1392_v15 = vpop.eup %1391 }
 0x4e8   :  { %v1394_v16 = vpop.eup %1393  ;;  %1225 = vmatprep.mubr.msk.f32.mxu0 %vm470_vm3, %v1392_v15 }
 0x4e9   :  { %1226 = vmatmul.mubr.msk.f32.vlgmr.msra.gmra.mrb[10].mxu0 %vm470_vm3, %v1394_v16  ;;  %v1367_v17 = vpack.c.bf16 %v1394_v16, %v1392_v15 }
 0x4ea   :  { %1239 = vmatprep.mubr.msk.f32.mxu0 %vm1403_vm0, %v1401_v3 }
 0x4eb   :  { %1368 = vmatpush3.bf16.msra.mxu0 %v1367_v17 }
 0x4ec   :  { %1369 = vmatprep.subr.bf16.mxu0 %v1402_v4 }
 0x4ee   :  { %1240 = vmatmul.mubr.msk.f32.vlgmr.msra.gmra.mrb[12].mxu0 %vm733_vm5, %v465_v18 }
 0x4ef   :  { %1263 = vmatprep.mubr.msk.f32.mxu0 %vm1403_vm0, %v1401_v3  ;;  %1371 = vmatpush3.bf16.msra.mxu0 %v1370_v25 }
 0x4f0   :  { %1372 = vmatprep.subr.bf16.mxu0 %v1402_v4 }
 0x5bc   :  { %v1227_v22 = vpop.f32.mrb[10].mxu0 }
 0x5bd   :  { %v732_v23 = vmul.f32 %v1227_v22, %v452_v20  ;;  %v722_v24 = vpop.f32.mrb[11].mxu0 }
 0x5be   :  { %v731_v26 = vmul.f32 %v722_v24, %v446_v21 }
 0x5c0   :  { %v1364_v30 = vpack.c.bf16 %v732_v23, %v731_v26 }
 0x5c1   :  { %v873_v32 = vpop.f32.mrb[12].mxu0 }
 0x5c2   :  { %1365 = vmatpush3.bf16.msra.mxu1 %v1364_v30  ;;  %v1241_v33 = vpop.f32.mrb[13].mxu0 }
 0x5c3   :  { %1242 = vmatprep.subr.mxu1 %v1401_v3 }
 0x5c5   :  { %1233 = vmatmul.mubr.msk.f32.vlgmr.msra.gmra.mrb[14].mxu1 %vm733_vm5, %v465_v18 }
 0x5c6   :  { %1243 = vmatpush3.msra.mxu1 %v464_v60  ;;  %1244 = vmatprep.mubr.msk.f32.mxu1 %vm1403_vm0, %v1401_v3  ;;  %v955_v3 = vld [vmem:[%s1804_s1 + $0x2b0] sm:$0xff]  ;;  %v1058_v60 = vpop.permute.xlu0 %1057 }
 0x5c7   :  { %v1373_v35 = vpack.c.bf16 %v955_v3, %v954_v34 }
 0x5c9   :  { %1245 = vmatmul.mubr.msk.f32.vlgmr.msra.gmra.mrb[16].mxu1 %vm470_vm3, %v873_v32  ;;  %1374 = vmatpush3.bf16.msra.mxu0 %v1373_v35 }
 0x5ca   :  { %1375 = vmatprep.subr.bf16.mxu0 %v1402_v4 }
 0x5cd   :  { %1377 = vmatpush3.bf16.msra.mxu0 %v1376_v37 }
 0x5ce   :  { %1378 = vmatprep.subr.bf16.mxu0 %v1402_v4  ;;  %v960_v4 = vld [vmem:[%s1804_s1 + $0x423] ss:$0 sm:$0xff] }
 0x5d1   :  { %1380 = vmatpush3.bf16.msra.mxu0 %v1379_v40 }
 0x698   :  { %v803_v41 = vpop.f32.mrb[14].mxu1 }
 0x699   :  { %v1234_v42 = vpop.f32.mrb[15].mxu1 }
 0x69c   :  { %v946_v43 = vpop.f32.mrb[16].mxu1 }
 0x69d   :  { %1395 = vrcp.f32 %v946_v43  ;;  %v1246_v44 = vpop.f32.mrb[17].mxu1 }
 0x6a7   :  { %v1396_v45 = vpop.eup %1395 }
 0x6a8   :  { %v951_v46 = vmul.f32 %v1396_v45, %v803_v41 }
 0x6aa   :  { %1264 = vmatmul.mubr.msk.f32.vlgmr.msra.gmra.mrb[14].mxu0 %vm362_vm2, %v951_v46 }
 0x77d   :  { %v1030_v47 = vpop.f32.mrb[14].mxu0 }
 0x77e   :  { %v1031_v48 = vadd.f32 %v1030_v47, %v960_v4  ;;  %v1265_v49 = vpop.f32.mrb[15].mxu0 }
 0x780   :  { %1047 = vrot.lane.b32.xlu1 %v1031_v48, %s1404_s7  ;;  %v1034_v50 = vadd.f32 %v1031_v48, %v1677_v9 }
 0x782   :  { %v1083_v51 = vmul.f32 -1.442695, %v1034_v50 }
 0x784   :  { %1397 = vpow2.f32 %v1083_v51 }
 0x78e   :  { %v1398_v27 = vpop.eup %1397 }
 0x78f   :  { %v1038_v52 = vadd.f32 1.0, %v1398_v27 }
 0x791   :  { %1399 = vrcp.f32 %v1038_v52 }
 0x79b   :  { %v1400_v53 = vpop.eup %1399 }
 0x79c   :  { %v1045_v54 = vsub.f32 1.0, %v1400_v53  ;;  %v1044_v57 = vmul.f32 %v1400_v53, %v1042_v55 }
 0x7f2   :  { %v1048_v56 = vpop.permute.xlu1 %1047 }
 0x7f3   :  { %v1050_v58 = vmul.f32 %v1048_v56, %v1045_v54 }
 0x7f5   :  { %v1051_v59 = vadd.f32 %v1050_v58, %v1044_v57 }
 0x7f7   :  { %1053 = vrot.lane.b32.xlu1 %v1051_v59, %s1404_s7 }
 0x869   :  { %v1054_v61 = vpop.permute.xlu1 %1053 }
 0x86a   :  { %v1060_v62 = vsel %vm362_vm2, %v1054_v61, %v1058_v60 }
 0x86b   :  { %1061 = vst [vmem:[%s1806_s2] sm:$0xff] %v1060_v62 }

</bundles_post_ra>
